<compile_context>
chip_gen: v7x
topology: tpu7x:2x2x1
jax: 0.10.0
libtpu: 0.0.40
codegen_flags: <defaults>
</compile_context>

<pallas_src>
import jax
import jax.numpy as jnp
from jax.experimental import pallas as pl
from jax.experimental.pallas import tpu as pltpu

BN_EPS = 1e-5  # nn.BatchNorm2d default eps


# ----------------------------------------------------------------------------
# Pallas kernel: fully fused attention gate for one (batch, pixel-tile) block
# ----------------------------------------------------------------------------
def _attention_kernel(g_ref, x_ref, wg_ref, wx_ref, wpsi_t_ref, bgx_ref,
                      bpsi_ref, o_ref):
    """g_ref     : (1, F_g, TM)   gating tile  (channels on sublanes, pixels on lanes)
       x_ref     : (1, F_l, TM)   skip-connection tile
       wg_ref    : (F_int, F_g)   BN-folded W_g 1x1 conv weight
       wx_ref    : (F_int, F_l)   BN-folded W_x 1x1 conv weight
       wpsi_t_ref: (1, F_int)     BN-folded psi 1x1 conv weight (row vector)
       bgx_ref   : (F_int, 1)     combined shift of the W_g and W_x branches
       bpsi_ref  : (1, 1)         shift of the psi branch
       o_ref     : (1, F_l, TM)   output tile = x * sigmoid(psi)
    """
    g = g_ref[0]                     # (F_g, TM)
    x = x_ref[0]                     # (F_l, TM)

    # Two MXU matmuls, f32 accumulation; lane-dense over TM pixels.
    g1 = jnp.dot(wg_ref[...], g, preferred_element_type=jnp.float32)
    x1 = jnp.dot(wx_ref[...], x, preferred_element_type=jnp.float32)

    s = jnp.maximum(g1 + x1 + bgx_ref[...], 0.0)        # ReLU, (F_int, TM)

    # 1-channel psi projection as a tiny MXU matmul -> (1, TM), lane-dense.
    z = jnp.dot(wpsi_t_ref[...], s,
                preferred_element_type=jnp.float32) + bpsi_ref[...]
    # Sigmoid: exp on the EUP, reciprocal (approx) also on the EUP.
    psi = pl.reciprocal(1.0 + jnp.exp(-z), approx=True)  # (1, TM)

    o_ref[0] = (x * psi).astype(o_ref.dtype)             # broadcast over F_l


# ----------------------------------------------------------------------------
# Tile selection
# ----------------------------------------------------------------------------
def _round_up(v, m):
    return ((v + m - 1) // m) * m


def _choose_tile(P, n_batch, tile_pixels, bytes_per_pixel,
                 vmem_budget=12 << 20, min_steps=8):
    """Largest lane-dense pixel tile that (a) fits the double-buffered VMEM
    budget (g/x/out blocks x 2 buffers), (b) does not exceed the requested
    target, and (c) still leaves >= min_steps grid steps when possible (so both
    v7x TensorCores get work and pipeline bubbles stay hidden)."""
    tm_vmem = max(128, (vmem_budget // (2 * bytes_per_pixel)) // 128 * 128)
    tm = min(_round_up(P, 128), _round_up(tile_pixels, 128), tm_vmem)
    while tm > 128 and n_batch * pl.cdiv(P, tm) < min_steps:
        tm = max(128, _round_up(tm // 2, 128))
    return tm


# ----------------------------------------------------------------------------
# Wrapper
# ----------------------------------------------------------------------------
def attention_block(g, x, params, *, tile_pixels=8192):
    """Attention gate forward.  g: (N, F_g, H, W), x: (N, F_l, H, W), NCHW.

    Works for f32 (default) or bf16 I/O; matmuls always accumulate in f32."""
    N, F_g, H, W = g.shape
    _, F_l, _, _ = x.shape
    F_int = params["wg_eff"].shape[0]
    P = H * W

    dt_bytes = jnp.dtype(x.dtype).itemsize
    bytes_per_pixel = (F_g + 2 * F_l) * dt_bytes        # g in + x in + out
    tm = _choose_tile(P, N, tile_pixels, bytes_per_pixel)
    n_tiles = pl.cdiv(P, tm)                            # ragged last tile is OK

    g2 = g.reshape(N, F_g, P)
    x2 = x.reshape(N, F_l, P)

    # Advisory cost estimate: memory-bound custom call of this size.
    flops = N * P * (2 * F_int * (F_g + F_l + 1) + 4 * F_int + 4)
    weight_bytes = 4 * (F_int * (F_g + F_l + 2) + 1)
    cost = pl.CostEstimate(flops=flops,
                           transcendentals=N * P,
                           bytes_accessed=N * P * bytes_per_pixel + weight_bytes)

    out = pl.pallas_call(
        _attention_kernel,
        out_shape=jax.ShapeDtypeStruct((N, F_l, P), x.dtype),
        grid=(N, n_tiles),
        in_specs=[
            pl.BlockSpec((1, F_g, tm), lambda n, t: (n, 0, t)),
            pl.BlockSpec((1, F_l, tm), lambda n, t: (n, 0, t)),
            pl.BlockSpec((F_int, F_g), lambda n, t: (0, 0)),
            pl.BlockSpec((F_int, F_l), lambda n, t: (0, 0)),
            pl.BlockSpec((1, F_int), lambda n, t: (0, 0)),
            pl.BlockSpec((F_int, 1), lambda n, t: (0, 0)),
            pl.BlockSpec((1, 1), lambda n, t: (0, 0)),
        ],
        out_specs=pl.BlockSpec((1, F_l, tm), lambda n, t: (n, 0, t)),
        compiler_params=pltpu.CompilerParams(
            dimension_semantics=("parallel", "parallel")),
        cost_estimate=cost,
    )(g2, x2, params["wg_eff"], params["wx_eff"], params["wpsi_t"],
      params["bgx"], params["bpsi"])

    return out.reshape(N, F_l, H, W)


# ----------------------------------------------------------------------------
# Parameter construction + BN folding (inference-mode BatchNorm)
# ----------------------------------------------------------------------------
def init_conv_bn(key, cin, cout):
    ks = jax.random.split(key, 6)
    w = jax.random.normal(ks[0], (cout, cin), jnp.float32) / jnp.sqrt(
        jnp.float32(cin))
    b = 0.05 * jax.random.normal(ks[1], (cout,), jnp.float32)
    gamma = 1.0 + 0.1 * jax.random.normal(ks[2], (cout,), jnp.float32)
    beta = 0.1 * jax.random.normal(ks[3], (cout,), jnp.float32)
    mean = 0.1 * jax.random.normal(ks[4], (cout,), jnp.float32)
    var = 0.5 + jax.random.uniform(ks[5], (cout,), jnp.float32)
    return (w, b, gamma, beta, mean, var)


def _fold_conv_bn(w, b, gamma, beta, mean, var, eps=BN_EPS):
    scale = gamma / jnp.sqrt(var + eps)
    w_eff = w * scale[:, None]                       # (Cout, Cin)
    shift = beta + (b - mean) * scale                # (Cout,)
    return w_eff, shift[:, None]                     # shift as (Cout, 1)


def fold_params(raw, eps=BN_EPS):
    wg_eff, sg = _fold_conv_bn(*raw["Wg"], eps=eps)
    wx_eff, sx = _fold_conv_bn(*raw["Wx"], eps=eps)
    wpsi_eff, sp = _fold_conv_bn(*raw["psi"], eps=eps)   # (1, F_int), (1, 1)
    return {
        "wg_eff": wg_eff,            # (F_int, F_g)
        "wx_eff": wx_eff,            # (F_int, F_l)
        "wpsi_t": wpsi_eff,          # (1, F_int) row vector for the MXU matmul
        "bgx": sg + sx,              # (F_int, 1)
        "bpsi": sp,                  # (1, 1)
    }


# ----------------------------------------------------------------------------
# Pure-JAX reference (eval-mode BatchNorm), for correctness checking
# ----------------------------------------------------------------------------
def attention_block_reference(g, x, raw, eps=BN_EPS):
    def conv_bn(y, w, b, gamma, beta, mean, var):
        z = jnp.einsum("oc,nchw->nohw", w, y) + b[None, :, None, None]
        inv = gamma / jnp.sqrt(var + eps)
        return (z - mean[None, :, None, None]) * inv[None, :, None, None] \
            + beta[None, :, None, None]

    g1 = conv_bn(g, *raw["Wg"])
    x1 = conv_bn(x, *raw["Wx"])
    s = jnp.maximum(g1 + x1, 0.0)
    psi = jax.nn.sigmoid(conv_bn(s, *raw["psi"]))
    return x * psi


# ----------------------------------------------------------------------------
if __name__ == "__main__":
    key = jax.random.PRNGKey(0)
    kg, kx, k1, k2, k3 = jax.random.split(key, 5)

    # Small shapes consistent with the module: F_g = F_l = 32, F_int = 16.
    N, F_g, F_l, F_int, H, W = 2, 32, 32, 16, 16, 16

    raw = {
        "Wg": init_conv_bn(k1, F_g, F_int),
        "Wx": init_conv_bn(k2, F_l, F_int),
        "psi": init_conv_bn(k3, F_int, 1),
    }
    params = fold_params(raw)

    g = jax.random.normal(kg, (N, F_g, H, W), jnp.float32)
    x = jax.random.normal(kx, (N, F_l, H, W), jnp.float32)

    fwd = jax.jit(attention_block)
    out = fwd(g, x, params)
    jax.block_until_ready(out)

    ref = attention_block_reference(g, x, raw)

    assert out.shape == (N, F_l, H, W), out.shape
    assert bool(jnp.all(jnp.isfinite(out)))
    # Tolerance allows for the approximate (EUP) reciprocal in the sigmoid.
    assert bool(jnp.allclose(out, ref, atol=5e-3, rtol=5e-3)), \
        float(jnp.max(jnp.abs(out - ref)))
    print("KERNEL_OK")
</pallas_src>

<mosaic_0001>
module attributes {stable_mosaic.version = 11 : i64} {
  func.func @_attention_kernel(%arg0: i32, %arg1: i32, %arg2: memref<1x32x128xf32, #tpu.memory_space<vmem>>, %arg3: memref<1x32x128xf32, #tpu.memory_space<vmem>>, %arg4: memref<16x32xf32, #tpu.memory_space<vmem>>, %arg5: memref<16x32xf32, #tpu.memory_space<vmem>>, %arg6: memref<1x16xf32, #tpu.memory_space<vmem>>, %arg7: memref<16x1xf32, #tpu.memory_space<vmem>>, %arg8: memref<1x1xf32, #tpu.memory_space<vmem>>, %arg9: memref<1x32x128xf32, #tpu.memory_space<vmem>>) attributes {dimension_semantics = [#tpu.dimension_semantics<parallel>, #tpu.dimension_semantics<parallel>], iteration_bounds = array<i64: 2, 2>, scalar_prefetch = 0 : i64, scratch_operands = 0 : i64, tpu.core_type = #tpu.core_type<tc>, window_params = [{transform_indices = @transform_0, window_bounds = array<i64: 1, 32, 128>}, {transform_indices = @transform_1, window_bounds = array<i64: 1, 32, 128>}, {pipeline_mode = #tpu.pipeline_mode<synchronous>, transform_indices = @transform_2, window_bounds = array<i64: 16, 32>}, {pipeline_mode = #tpu.pipeline_mode<synchronous>, transform_indices = @transform_3, window_bounds = array<i64: 16, 32>}, {pipeline_mode = #tpu.pipeline_mode<synchronous>, transform_indices = @transform_4, window_bounds = array<i64: 1, 16>}, {pipeline_mode = #tpu.pipeline_mode<synchronous>, transform_indices = @transform_5, window_bounds = array<i64: 16, 1>}, {pipeline_mode = #tpu.pipeline_mode<synchronous>, transform_indices = @transform_6, window_bounds = array<i64: 1, 1>}, {transform_indices = @transform_7, window_bounds = array<i64: 1, 32, 128>}]} {
    %c0 = arith.constant 0 : index
    %c0_0 = arith.constant 0 : index
    %c0_1 = arith.constant 0 : index
    %0 = vector.load %arg2[%c0, %c0_0, %c0_1] : memref<1x32x128xf32, #tpu.memory_space<vmem>>, vector<1x32x128xf32>
    %1 = vector.shape_cast %0 : vector<1x32x128xf32> to vector<32x128xf32>
    %c0_2 = arith.constant 0 : index
    %c0_3 = arith.constant 0 : index
    %c0_4 = arith.constant 0 : index
    %2 = vector.load %arg3[%c0_2, %c0_3, %c0_4] : memref<1x32x128xf32, #tpu.memory_space<vmem>>, vector<1x32x128xf32>
    %3 = vector.shape_cast %2 : vector<1x32x128xf32> to vector<32x128xf32>
    %c0_5 = arith.constant 0 : index
    %c0_6 = arith.constant 0 : index
    %4 = vector.load %arg4[%c0_5, %c0_6] : memref<16x32xf32, #tpu.memory_space<vmem>>, vector<16x32xf32>
    %cst = arith.constant dense<0.000000e+00> : vector<16x128xf32>
    %5 = tpu.matmul %4, %1, %cst {dimension_numbers = #tpu.dot_dimension_numbers<[1], [0], [0], [1], [0, 0, 1, 1], [], []>} : vector<16x32xf32>, vector<32x128xf32>, vector<16x128xf32> -> vector<16x128xf32>
    %c0_7 = arith.constant 0 : index
    %c0_8 = arith.constant 0 : index
    %6 = vector.load %arg5[%c0_7, %c0_8] : memref<16x32xf32, #tpu.memory_space<vmem>>, vector<16x32xf32>
    %cst_9 = arith.constant dense<0.000000e+00> : vector<16x128xf32>
    %7 = tpu.matmul %6, %3, %cst_9 {dimension_numbers = #tpu.dot_dimension_numbers<[1], [0], [0], [1], [0, 0, 1, 1], [], []>} : vector<16x32xf32>, vector<32x128xf32>, vector<16x128xf32> -> vector<16x128xf32>
    %8 = arith.addf %5, %7 : vector<16x128xf32>
    %c0_10 = arith.constant 0 : index
    %c0_11 = arith.constant 0 : index
    %9 = vector.load %arg7[%c0_10, %c0_11] : memref<16x1xf32, #tpu.memory_space<vmem>>, vector<16x1xf32>
    %10 = vector.broadcast %9 : vector<16x1xf32> to vector<16x128xf32>
    %11 = arith.addf %8, %10 : vector<16x128xf32>
    %cst_12 = arith.constant 0.000000e+00 : f32
    %12 = vector.broadcast %cst_12 : f32 to vector<16x128xf32>
    %13 = arith.maximumf %11, %12 : vector<16x128xf32>
    %c0_13 = arith.constant 0 : index
    %c0_14 = arith.constant 0 : index
    %14 = vector.load %arg6[%c0_13, %c0_14] : memref<1x16xf32, #tpu.memory_space<vmem>>, vector<1x16xf32>
    %cst_15 = arith.constant dense<0.000000e+00> : vector<1x128xf32>
    %15 = tpu.matmul %14, %13, %cst_15 {dimension_numbers = #tpu.dot_dimension_numbers<[1], [0], [0], [1], [0, 0, 1, 1], [], []>} : vector<1x16xf32>, vector<16x128xf32>, vector<1x128xf32> -> vector<1x128xf32>
    %c0_16 = arith.constant 0 : index
    %c0_17 = arith.constant 0 : index
    %16 = vector.load %arg8[%c0_16, %c0_17] : memref<1x1xf32, #tpu.memory_space<vmem>>, vector<1x1xf32>
    %17 = vector.broadcast %16 : vector<1x1xf32> to vector<1x128xf32>
    %18 = arith.addf %15, %17 : vector<1x128xf32>
    %cst_18 = arith.constant 0.000000e+00 : f32
    %19 = vector.broadcast %cst_18 : f32 to vector<1x128xf32>
    %20 = arith.subf %19, %18 : vector<1x128xf32>
    %21 = math.exp %20 : vector<1x128xf32>
    %cst_19 = arith.constant 1.000000e+00 : f32
    %22 = vector.broadcast %cst_19 : f32 to vector<1x128xf32>
    %23 = arith.addf %22, %21 : vector<1x128xf32>
    %24 = tpu.reciprocal %23 {approx = true} : vector<1x128xf32> -> vector<1x128xf32>
    %25 = vector.broadcast %24 : vector<1x128xf32> to vector<32x128xf32>
    %26 = arith.mulf %3, %25 : vector<32x128xf32>
    %c0_20 = arith.constant 0 : index
    %c0_21 = arith.constant 0 : index
    %c0_22 = arith.constant 0 : index
    %27 = vector.load %arg9[%c0_20, %c0_21, %c0_22] : memref<1x32x128xf32, #tpu.memory_space<vmem>>, vector<1x32x128xf32>
    %28 = vector.shape_cast %27 : vector<1x32x128xf32> to vector<32x128xf32>
    %29 = vector.shape_cast %26 : vector<32x128xf32> to vector<1x32x128xf32>
    tpu.vector_store %arg9[%c0_20, %c0_21, %c0_22], %29 {strides = array<i32>} : memref<1x32x128xf32, #tpu.memory_space<vmem>>, vector<1x32x128xf32>,
    return
  }
  func.func @transform_0(%arg0: i32, %arg1: i32) -> (i32, i32, i32) {
    %c0_i32 = arith.constant 0 : i32
    %c0_i32_0 = arith.constant 0 : i32
    return %arg0, %c0_i32, %arg1 : i32, i32, i32
  }
  func.func @transform_1(%arg0: i32, %arg1: i32) -> (i32, i32, i32) {
    %c0_i32 = arith.constant 0 : i32
    %c0_i32_0 = arith.constant 0 : i32
    return %arg0, %c0_i32, %arg1 : i32, i32, i32
  }
  func.func @transform_2(%arg0: i32, %arg1: i32) -> (i32, i32) {
    %c0_i32 = arith.constant 0 : i32
    %c0_i32_0 = arith.constant 0 : i32
    %c0_i32_1 = arith.constant 0 : i32
    return %c0_i32, %c0_i32_0 : i32, i32
  }
  func.func @transform_3(%arg0: i32, %arg1: i32) -> (i32, i32) {
    %c0_i32 = arith.constant 0 : i32
    %c0_i32_0 = arith.constant 0 : i32
    %c0_i32_1 = arith.constant 0 : i32
    return %c0_i32, %c0_i32_0 : i32, i32
  }
  func.func @transform_4(%arg0: i32, %arg1: i32) -> (i32, i32) {
    %c0_i32 = arith.constant 0 : i32
    %c0_i32_0 = arith.constant 0 : i32
    %c0_i32_1 = arith.constant 0 : i32
    return %c0_i32, %c0_i32_0 : i32, i32
  }
  func.func @transform_5(%arg0: i32, %arg1: i32) -> (i32, i32) {
    %c0_i32 = arith.constant 0 : i32
    %c0_i32_0 = arith.constant 0 : i32
    %c0_i32_1 = arith.constant 0 : i32
    return %c0_i32, %c0_i32_0 : i32, i32
  }
  func.func @transform_6(%arg0: i32, %arg1: i32) -> (i32, i32) {
    %c0_i32 = arith.constant 0 : i32
    %c0_i32_0 = arith.constant 0 : i32
    %c0_i32_1 = arith.constant 0 : i32
    return %c0_i32, %c0_i32_0 : i32, i32
  }
  func.func @transform_7(%arg0: i32, %arg1: i32) -> (i32, i32, i32) {
    %c0_i32 = arith.constant 0 : i32
    %c0_i32_0 = arith.constant 0 : i32
    return %arg0, %c0_i32, %arg1 : i32, i32, i32
  }
}

</mosaic_0001>

<bundles_post_ra>
// kernel: attention_block.1
= control target key start
LH: loop header
LB: loop body
LE: loop exit
PB: predicated region body
PF: predicated region fallthrough
CT: control target
= control target key end

     0   :  { %s1263_s0 = inlined_call_operand.vmem [shape: f32[2,32,256], index: 0, kind: input, shape index: {}]   ;;  %s1264_s1 = inlined_call_operand.vmem [shape: f32[2,32,256], index: 1, kind: input, shape index: {}]   ;;  %s1265_s2 = inlined_call_operand.vmem [shape: f32[16,32], index: 2, kind: input, shape index: {}]   ;;  %s1266_s3 = inlined_call_operand.vmem [shape: f32[16,32], index: 3, kind: input, shape index: {}]   ;;  %s1267_s4 = inlined_call_operand.vmem [shape: f32[1,16], index: 4, kind: input, shape index: {}]   ;;  %s1268_s5 = inlined_call_operand.vmem [shape: f32[16,1], index: 5, kind: input, shape index: {}]   ;;  %s1269_s6 = inlined_call_operand.<no memory space> [shape: f32[1,1], index: 6, kind: input, shape index: {}]   ;;  %s1270_s7 = inlined_call_operand.vmem [shape: f32[2,32,256], index: 7, kind: output, shape index: {}]  }
   0x1   :  { %v12_v0 = vstv %s1269_s6 }
   0x2   :  { %13 = vst [vmem:[#allocation2] sm:$0x1] %v12_v0 }
   0x3   :  { %s1107_s26 = smov 0   ;;  %s1109_s27 = smov 0  }
   0x4   :  { %s1111_s28 = smov 0   ;;  %s1113_s29 = smov 0  }
   0x5   :  { %s1115_s30 = smov 0   ;;  %s1117_s8 = smov 0  }
   0x6   :  { %s1119_s9 = smov 0  }
   0x7 LB: > { %s28_s6 = sadd.s32 1, %s1050_s30  ;;  %s31_s10 = sadd.s32 1, %s1054_s8  ;;  %s1058_s9 = sphi %s1119_s9, %s19_s9   ;;  %s1054_s8 = sphi %s1117_s8, %s1278_s8   ;;  %s1050_s30 = sphi %s1115_s30, %s1277_s30   ;;  %s1046_s29 = sphi %s1113_s29, %s1276_s29   ;;  %s1042_s28 = sphi %s1111_s28, %s1275_s28   ;;  %s1038_s27 = sphi %s1109_s27, %s1274_s27   ;;  %s1034_s26 = sphi %s1107_s26, %s1273_s26  }
   0x8   : > { %p29_p0 = scmp.ge.s32.totalorder %s28_s6, 2  ;;  %s849_s11 = sadd.s32 4294967295, %s1058_s9  }
   0x9   : > { %p47_p1 = scmp.ne.s32.totalorder %s1038_s27, %s1034_s26  ;;  %p48_p2 = scmp.eq.s32.totalorder %s1058_s9, 0 }
   0xa   : > { %s1280_s6 = smov (%p29_p0, %s28_s6), 0  ;;  %s1282_s10 = smov (!%p29_p0, %s31_s10), %s1054_s8 }
   0xb   : > { %p33_p3 = scmp.ge.s32.totalorder %s1282_s10, 2  ;;  %p212_p4 = scmp.eq.s32.totalorder %s849_s11, 3 }
   0xc   : > { %s36_s12 = ssub.s32 %s1050_s30, %s1280_s6  ;;  %p1153_p5 = por %p48_p2, %p47_p1 }
   0xd   : > { %s1284_s10 = smov (%p33_p3, %s1282_s10), 0  ;;  %p1159_p6 = por %p212_p4, %p47_p1 }
   0xe   : > { %s35_s15 = ssub.s32 %s1054_s8, %s1284_s10  ;;  %s40_s17 = sadd.s32 1, %s1038_s27 }
   0xf   : > { %s37_s16 = sor.u32 %s36_s12, %s35_s15  ;;  %p852_p8 = scmp.ge.s32.totalorder %s1058_s9, 4 }
  0x10   : > { %p38_p7 = scmp.eq.s32.totalorder %s37_s16, 0 }
  0x11   : > { %249 = sbr.rel (%p852_p8) target bundleno = 40 (0x28), region = 36 }
  0x12   : > { %s1167_s18 = scalar_select %p38_p7, %s1038_s27, %s40_s17  }
  0x18   : > { %252 = sbr.rel (!%p1153_p5) target bundleno = 32 (0x20), region = 40  ;;  %s254_s19 = sand.u32 (%p1153_p5), 1, %s1038_s27  }
  0x19   : > { %s854_s20 = sshll.u32 (%p1153_p5), %s1054_s8, 3  ;;  %s853_s21 = sshll.u32 (%p1153_p5), %s254_s19, 5 }
  0x1a   : > { %s258_s22 = sadd.s32 (%p1153_p5), %s1050_s30, %s854_s20  ;;  %s256_s12 = scalar_lea.vmem (%p1153_p5), [#allocation3], %s853_s21 }
  0x1b   : > { %s855_s23 = sshll.u32 (%p1153_p5), %s258_s22, 3 }
  0x1c   : > { %s260_s11 = scalar_lea.vmem (%p1153_p5), %s1263_s0, %s855_s23 }
  0x1d   : > { %v294_v1 = vld [vmem:[%s260_s11] sm:$0xff] (%p1153_p5)  ;;  %v296_v2 = vld [vmem:[%s260_s11 + $0x10] sm:$0xff] (%p1153_p5) }
  0x1e   : > { %v298_v3 = vld [vmem:[%s260_s11 + $0x20] sm:$0xff] (%p1153_p5)  ;;  %295 = vst [vmem:[%s256_s12] sm:$0xff] (%p1153_p5), %v294_v1  ;;  %297 = vst [vmem:[%s256_s12 + $0x8] sm:$0xff] (%p1153_p5), %v296_v2  ;;  %v300_v4 = vld [vmem:[%s260_s11 + $0x30] sm:$0xff] (%p1153_p5) }
  0x1f   : > { %299 = vst [vmem:[%s256_s12 + $0x10] sm:$0xff] %v298_v3  ;;  %301 = vst [vmem:[%s256_s12 + $0x18] sm:$0xff] %v300_v4 }
  0x20 PF: > { %307 = sbr.rel (!%p1153_p5) target bundleno = 40 (0x28), region = 78  ;;  %s309_s15 = sand.u32 (%p1153_p5), 1, %s1038_s27  }
  0x21   : > { %s857_s16 = sshll.u32 (%p1153_p5), %s1054_s8, 3  ;;  %s856_s17 = sshll.u32 (%p1153_p5), %s309_s15, 5 }
  0x22   : > { %s313_s19 = sadd.s32 (%p1153_p5), %s1050_s30, %s857_s16  ;;  %s311_s24 = scalar_lea.vmem (%p1153_p5), [#allocation4], %s856_s17 }
  0x23   : > { %s858_s20 = sshll.u32 (%p1153_p5), %s313_s19, 3 }
  0x24   : > { %s315_s21 = scalar_lea.vmem (%p1153_p5), %s1264_s1, %s858_s20 }
  0x25   : > { %v349_v5 = vld [vmem:[%s315_s21] sm:$0xff] (%p1153_p5)  ;;  %v351_v6 = vld [vmem:[%s315_s21 + $0x10] sm:$0xff] (%p1153_p5) }
  0x26   : > { %v353_v7 = vld [vmem:[%s315_s21 + $0x20] sm:$0xff] (%p1153_p5)  ;;  %350 = vst [vmem:[%s311_s24] sm:$0xff] (%p1153_p5), %v349_v5  ;;  %352 = vst [vmem:[%s311_s24 + $0x8] sm:$0xff] (%p1153_p5), %v351_v6  ;;  %v355_v8 = vld [vmem:[%s315_s21 + $0x30] sm:$0xff] (%p1153_p5) }
  0x27   : > { %354 = vst [vmem:[%s311_s24 + $0x10] sm:$0xff] %v353_v7  ;;  %356 = vst [vmem:[%s311_s24 + $0x18] sm:$0xff] %v355_v8 }
  0x28 PF: > { %p859_p9 = scmp.ge.s32.totalorder %s1058_s9, 1  ;;  %p361_p10 = scmp.lt.s32.totalorder %s1058_s9, 5 }
  0x2a   : > { %p362_p11 = pnand %p859_p9, %p361_p10 }
  0x2b   : > { %s368_s13 = sand.u32 (!%p362_p11), 1, %s1034_s26   ;;  %v419_v9 = vld [vmem:[%s1266_s3] sm:$0xff] (!%p362_p11)  ;;  %vm421_vm0 = vcmask (!%p362_p11), 261120   ;;  %v1060_v12 = vmov (!%p362_p11), 0   ;;  %v585_v25 = vld [vmem:[%s1268_s5 + $0x8] sm:$0xff] (!%p362_p11)  ;;  %v1061_v28 = vmov (!%p362_p11), 0.0|0.0   ;;  %v607_v45 = vlaneseq (!%p362_p11) }
  0x2c   : > { %365 = sbr.rel (%p362_p11) target bundleno = 538 (0x21a), region = 116  ;;  %v417_v10 = vld [vmem:[%s1265_s2] sm:$0xff] (!%p362_p11)  ;;  %s1195_s16 = sshll.u32 (!%p362_p11), %s368_s13, 5  ;;  %896 = vmatprep.mubr.msk.f32.mxu1 (!%p362_p11), %vm421_vm0, %v419_v9  ;;  %998 = vset.pattern.permute.xlu0 (!%p362_p11), %v1060_v12  ;;  %v420_v26 = vld [vmem:[%s1266_s3 + $0x8] sm:$0xff] (!%p362_p11)  ;;  %vm1062_vm1 = vmmov (!%p362_p11), 0   ;;  %v1063_v29 = vmov (!%p362_p11), 0.0  }
  0x2d   : > { %907 = vmatprep.mubr.msk.f32.mxu0 (!%p362_p11), %vm421_vm0, %v417_v10  ;;  %v584_v11 = vld [vmem:[%s1268_s5] sm:$0xff] (!%p362_p11)  ;;  %999 = vset.pattern.permute.xlu1 (!%p362_p11), %v1060_v12  ;;  %s377_s26 = scalar_lea.vmem (!%p362_p11), [#allocation4], %s1195_s16  ;;  %s370_s20 = scalar_lea.vmem (!%p362_p11), [#allocation3], %s1195_s16  ;;  %v418_v27 = vld [vmem:[%s1265_s2 + $0x8] sm:$0xff] (!%p362_p11)  ;;  %vm611_vm2 = vcmask (!%p362_p11), 130048   ;;  %v608_v46 = vshrl.u32 (!%p362_p11), %v607_v45, 7 }
  0x2e   : > { %v1203_v13 = vld [vmem:[%s377_s26] sm:$0xff] (!%p362_p11)  ;;  %v1205_v14 = vld [vmem:[%s377_s26 + $0x8] sm:$0xff] (!%p362_p11)  ;;  %v1207_v15 = vld [vmem:[%s377_s26 + $0x10] sm:$0xff] (!%p362_p11)  ;;  %588 = vperm.xlu0 (!%p362_p11), %998, %v584_v11   ;;  %s408_s15 = scalar_lea.vmem (!%p362_p11), [#allocation5], %s1195_s16 }
  0x2f   : > { %v917_v16 = vpack.c.bf16 (!%p362_p11), %v1205_v14, %v1203_v13  ;;  %v409_v17 = vld [vmem:[%s370_s20] sm:$0xff] (!%p362_p11)  ;;  %v410_v18 = vld [vmem:[%s370_s20 + $0x8] sm:$0xff] (!%p362_p11)  ;;  %v1212_v19 = vld [vmem:[%s377_s26 + $0x18] sm:$0xff] (!%p362_p11)  ;;  %v609_v47 = vsub.s32 (!%p362_p11), 0, %v608_v46 }
  0x30   : > { %v925_v20 = vpack.c.bf16 (!%p362_p11), %v410_v18, %v409_v17  ;;  %v921_v21 = vpack.c.bf16 (!%p362_p11), %v1212_v19, %v1207_v15  ;;  %v411_v22 = vld [vmem:[%s370_s20 + $0x10] sm:$0xff] (!%p362_p11)  ;;  %v412_v23 = vld [vmem:[%s370_s20 + $0x18] sm:$0xff] (!%p362_p11) }
  0x31   : > { %918 = vmatprep.subr.bf16.mxu1 (!%p362_p11), %v917_v16  ;;  %v929_v24 = vpack.c.bf16 (!%p362_p11), %v412_v23, %v411_v22  ;;  %v601_v30 = vld [vmem:[#allocation2] sm:$0x1] (!%p362_p11) }
  0x32   : > { %926 = vmatprep.subr.bf16.mxu0 (!%p362_p11), %v925_v20  ;;  %920 = vmatpush3.bf16.msra.mxu1 (!%p362_p11), %v917_v16  ;;  %v600_v44 = vld [vmem:[%s1267_s4] sm:$0x1] (!%p362_p11) }
  0x33   : > { %928 = vmatpush3.bf16.msra.mxu0 %v925_v20  ;;  %922 = vmatprep.subr.bf16.mxu1 %v921_v21  ;;  %s869_s17 = sshll.u32 (%p1159_p6), %s1046_s29, 3 }
  0x34   : > { %930 = vmatprep.subr.bf16.mxu0 %v929_v24  ;;  %593 = vperm.xlu0 %998, %v585_v25   ;;  %s710_s19 = sadd.s32 (%p1159_p6), %s1042_s28, %s869_s17 }
  0x35   : > { %604 = vperm.xlu1 %999, %v601_v30   ;;  %s870_s26 = sshll.u32 (%p1159_p6), %s710_s19, 3 }
  0x36   : > { %924 = vmatpush3.bf16.msra.mxu1 %v921_v21  ;;  %s712_s16 = scalar_lea.vmem (%p1159_p6), %s1270_s7, %s870_s26 }
  0x37   : > { %932 = vmatpush3.bf16.msra.mxu0 %v929_v24  ;;  %933 = vmatprep.subr.bf16.mxu1 %v1061_v28 }
  0x39   : > { %897 = vmatmul.mubr.msk.f32.vlgmr.msra.gmra.mrb[0].mxu1 %vm421_vm0, %v420_v26 }
  0x3a   : > { %908 = vmatmul.mubr.msk.f32.vlgmr.msra.gmra.mrb[0].mxu0 %vm421_vm0, %v418_v27  ;;  %914 = vmatprep.mubr.msk.f32.mxu1 %vm1062_vm1, %v1063_v29 }
  0xad   : > { %v589_v31 = vpop.permute.xlu0 %588 }
  0xb3   : > { %v594_v37 = vpop.permute.xlu0 %593 }
  0xb4   : > { %v605_v48 = vpop.permute.xlu1 %604 }
  0xb5   : > { %v610_v49 = vrot.slane %v605_v48, %v609_v47 }
 0x10c   : > { %v898_v32 = vpop.f32.mrb[0].mxu1 }
 0x10d   : > { %v909_v33 = vpop.f32.mrb[0].mxu0  ;;  %v494_v34 = vpop.f32.mrb[1].mxu1 }
 0x10e   : > { %v581_v35 = vadd.f32 %v909_v33, %v898_v32  ;;  %v575_v36 = vpop.f32.mrb[1].mxu0 }
 0x10f   : > { %v576_v38 = vadd.f32 %v575_v36, %v494_v34 }
 0x110   : > { %v597_v39 = vadd.f32 %v594_v37, %v581_v35 }
 0x111   : > { %v596_v40 = vadd.f32 %v589_v31, %v576_v38 }
 0x112   : > { %v599_v41 = vmax.f32 %v597_v39, 0.0 }
 0x113   : > { %v598_v42 = vmax.f32 %v596_v40, 0.0 }
 0x115   : > { %v934_v43 = vpack.c.bf16 %v599_v41, %v598_v42 }
 0x117   : > { %935 = vmatpush3.bf16.msra.mxu1 %v934_v43 }
 0x11a   : > { %915 = vmatmul.mubr.msk.f32.vlgmr.msra.gmra.mrb[2].mxu1 %vm611_vm2, %v600_v44 }
 0x1ed   : > { %v681_v50 = vpop.f32.mrb[2].mxu1 }
 0x1ee   : > { %v682_v51 = vadd.f32 %v681_v50, %v610_v49  ;;  %v916_v52 = vpop.f32.mrb[3].mxu1 }
 0x1f0   : > { %v685_v53 = vsub.f32 0.0, %v682_v51 }
 0x1f2   : > { %v686_v54 = vmul.f32 1.442695, %v685_v53 }
 0x1f4   : > { %1000 = vpow2.f32 %v686_v54 }
 0x1fe   : > { %v1001_v55 = vpop.eup %1000 }
 0x1ff   : > { %v688_v56 = vadd.f32 1.0, %v1001_v55 }
 0x201   : > { %1002 = vrcp.f32 %v688_v56 }
 0x20b   : > { %v1003_v57 = vpop.eup %1002  ;;  %708 = sbr.rel (!%p1159_p6) target bundleno = 538 (0x21a), region = 128 }
 0x20c   : > { %v693_v58 = vrot.slane %v1003_v57, %v609_v47 }
 0x20e   : > { %v694_v59 = vmul.f32 %v693_v58, %v1203_v13  ;;  %v695_v60 = vmul.f32 %v693_v58, %v1205_v14  ;;  %v696_v61 = vmul.f32 %v693_v58, %v1207_v15  ;;  %v697_v62 = vmul.f32 %v693_v58, %v1212_v19 }
 0x210   : > { %698 = vst [vmem:[%s408_s15] sm:$0xff] %v694_v59  ;;  %699 = vst [vmem:[%s408_s15 + $0x8] sm:$0xff] %v695_v60 }
 0x211   : > { %700 = vst [vmem:[%s408_s15 + $0x10] sm:$0xff] %v696_v61  ;;  %701 = vst [vmem:[%s408_s15 + $0x18] sm:$0xff] %v697_v62 }
 0x217   : > { %v746_v63 = vld [vmem:[%s408_s15] sm:$0xff]  ;;  %v748_v0 = vld [vmem:[%s408_s15 + $0x8] sm:$0xff] }
 0x218   : > { %v750_v1 = vld [vmem:[%s408_s15 + $0x10] sm:$0xff]  ;;  %v752_v2 = vld [vmem:[%s408_s15 + $0x18] sm:$0xff]  ;;  %747 = vst [vmem:[%s712_s16] sm:$0xff] %v746_v63  ;;  %749 = vst [vmem:[%s712_s16 + $0x10] sm:$0xff] %v748_v0 }
 0x219   : > { %751 = vst [vmem:[%s712_s16 + $0x20] sm:$0xff] %v750_v1  ;;  %753 = vst [vmem:[%s712_s16 + $0x30] sm:$0xff] %v752_v2 }
 0x21a PF: > { %s19_s9 = sadd.s32 1, %s1058_s9   ;;  %s1273_s26 = smov %s1038_s27 }
 0x21b   : > { %p16_p12 = scmp.ge.s32.totalorder %s19_s9, 6   ;;  %s1274_s27 = smov %s1167_s18 }
 0x21c   : > { %s1275_s28 = smov %s1050_s30  ;;  %s1276_s29 = smov %s1054_s8 }
 0x21d   : > { %s1277_s30 = smov %s1280_s6  ;;  %s1278_s8 = smov %s1284_s10 }
 0x21e   :  { %18 = sbr.rel (!%p16_p12) target bundleno = 7 (0x7), region = 205 }

</bundles_post_ra>
